<compile_context>
chip_gen: v7x
topology: tpu7x:2x2x1
jax: 0.10.0
libtpu: 0.0.40
codegen_flags: <defaults>
</compile_context>

<pallas_src>
import jax
import jax.numpy as jnp
from jax.experimental import pallas as pl
from jax.experimental.pallas import tpu as pltpu


def _reward_reg_head_kernel(x_ref, w_ref, b_ref, o_ref):
    # Folded head: out = sum_d x[:, d] * w_eff[d] + b_eff  (VPU mul + XLU reduce).
    x = x_ref[...].astype(jnp.float32)            # [TB, D]
    w = w_ref[...].astype(jnp.float32)            # [1, D] resident row
    out = jnp.sum(x * w, axis=-1, keepdims=True)  # [TB, 1]
    out = out + b_ref[0, 0].astype(jnp.float32)
    o_ref[...] = out.astype(o_ref.dtype)


def reward_reg_head(x, w1, b1, w2, b2, *, tile_b=None):
    """x: [B, D]; w1: [D, 32]; b1: [1, 32]; w2: [32, 1]; b2: [1, 1] -> [B, 1]."""
    B, D = x.shape
    O = w2.shape[1]   # 1
    itemsize = jnp.dtype(x.dtype).itemsize

    # Fold the two linears (exact up to fp reordering; no nonlinearity between).
    w_eff = jnp.reshape(jnp.dot(w1, w2), (1, D)).astype(x.dtype)      # [1, D]
    b_eff = jnp.reshape(jnp.dot(b1, w2) + b2, (1, 1)).astype(x.dtype)  # [1, 1]

    if tile_b is None:
        # ~8 MiB per x tile: in the measured 4-12 MiB HBM-roofline sweet spot.
        target_tile_bytes = 8 * 1024 * 1024
        tile_b = max(8, (target_tile_bytes // (D * itemsize)) // 8 * 8)

    # Never exceed the (8-rounded) batch, and keep >= 2 grid steps when B
    # allows it so v7x's two TensorCores both get work ("parallel" axis).
    b_round8 = ((B + 7) // 8) * 8
    half_b_round8 = max(8, ((pl.cdiv(B, 2) + 7) // 8) * 8)
    tile_b = max(8, min(tile_b, b_round8, half_b_round8))

    num_tiles = pl.cdiv(B, tile_b)  # last block may be ragged; OOB writes masked

    # Scoped VMEM: 2x double-buffered x tiles + tiny resident weight/out blocks.
    # Cap at 48 MiB so the budget is valid even on v7x (64 MiB physical per TC).
    vmem_need = (2 * tile_b * D + 2 * D + 2 * tile_b + 1024) * itemsize
    vmem_limit = int(min(48 << 20, max(16 << 20, vmem_need + (4 << 20))))

    cost = pl.CostEstimate(
        flops=2 * B * D + 2 * B,
        transcendentals=0,
        bytes_accessed=(B * D + D + 1 + B * O) * itemsize,
    )

    out = pl.pallas_call(
        _reward_reg_head_kernel,
        out_shape=jax.ShapeDtypeStruct((B, O), x.dtype),
        grid=(num_tiles,),
        in_specs=[
            pl.BlockSpec((tile_b, D), lambda i: (i, 0)),        # x: streamed tiles
            pl.BlockSpec((1, D), lambda i: (0, 0)),             # w_eff: resident
            pl.BlockSpec(memory_space=pltpu.MemorySpace.SMEM),  # b_eff: SMEM scalar
        ],
        out_specs=pl.BlockSpec((tile_b, O), lambda i: (i, 0)),
        compiler_params=pltpu.CompilerParams(
            dimension_semantics=("parallel",),
            vmem_limit_bytes=vmem_limit,
        ),
        cost_estimate=cost,
    )(x, w_eff, b_eff)

    return out


def init_params(key, dim_in, hidden=32, out=1, dtype=jnp.float32):
    """Deterministic init mimicking nn.Linear's uniform(-1/sqrt(fan_in), +...)."""
    k1, k2, k3, k4 = jax.random.split(key, 4)
    bound1 = 1.0 / jnp.sqrt(dim_in)
    bound2 = 1.0 / jnp.sqrt(hidden)
    w1 = jax.random.uniform(k1, (dim_in, hidden), dtype, -bound1, bound1)
    b1 = jax.random.uniform(k2, (1, hidden), dtype, -bound1, bound1)
    w2 = jax.random.uniform(k3, (hidden, out), dtype, -bound2, bound2)
    b2 = jax.random.uniform(k4, (1, out), dtype, -bound2, bound2)
    return w1, b1, w2, b2


if __name__ == "__main__":
    key = jax.random.PRNGKey(0)
    kx, kx2, kp = jax.random.split(key, 3)

    dim_in = 64  # small shapes consistent with the module

    # Case 1: aligned batch.
    B = 8
    x = jax.random.normal(kx, (B, dim_in), jnp.float32)
    w1, b1, w2, b2 = init_params(kp, dim_in)
    out = jax.block_until_ready(reward_reg_head(x, w1, b1, w2, b2))
    ref = (x @ w1 + b1) @ w2 + b2
    assert out.shape == (B, 1)
    assert jnp.allclose(out, ref, atol=1e-4, rtol=1e-4)

    # Case 2: ragged batch (exercises masked OOB writes on the last block,
    # i.e. the no-pad path), multiple grid steps.
    B2 = 13
    x2 = jax.random.normal(kx2, (B2, dim_in), jnp.float32)
    out2 = jax.block_until_ready(reward_reg_head(x2, w1, b1, w2, b2))
    ref2 = (x2 @ w1 + b1) @ w2 + b2
    assert out2.shape == (B2, 1)
    assert jnp.allclose(out2, ref2, atol=1e-4, rtol=1e-4)

    print("KERNEL_OK")
</pallas_src>

<mosaic_0001>
module attributes {stable_mosaic.version = 11 : i64} {
  func.func @_reward_reg_head_kernel(%arg0: i32, %arg1: memref<8x64xf32, #tpu.memory_space<vmem>>, %arg2: memref<1x64xf32, #tpu.memory_space<vmem>>, %arg3: memref<1x1xf32, #tpu.memory_space<smem>>, %arg4: memref<8x1xf32, #tpu.memory_space<vmem>>) attributes {dimension_semantics = [#tpu.dimension_semantics<parallel>], iteration_bounds = array<i64: 1>, scalar_prefetch = 0 : i64, scratch_operands = 0 : i64, tpu.core_type = #tpu.core_type<tc>, window_params = [{transform_indices = @transform_0, window_bounds = array<i64: 8, 64>}, {pipeline_mode = #tpu.pipeline_mode<synchronous>, transform_indices = @transform_1, window_bounds = array<i64: 1, 64>}, {transform_indices = @transform_2, window_bounds = array<i64: 1, 1>}, {transform_indices = @transform_3, window_bounds = array<i64: 8, 1>}]} {
    %c0 = arith.constant 0 : index
    %c0_0 = arith.constant 0 : index
    %0 = vector.load %arg1[%c0, %c0_0] : memref<8x64xf32, #tpu.memory_space<vmem>>, vector<8x64xf32>
    %c0_1 = arith.constant 0 : index
    %c0_2 = arith.constant 0 : index
    %1 = vector.load %arg2[%c0_1, %c0_2] : memref<1x64xf32, #tpu.memory_space<vmem>>, vector<1x64xf32>
    %2 = vector.broadcast %1 : vector<1x64xf32> to vector<8x64xf32>
    %3 = arith.mulf %0, %2 : vector<8x64xf32>
    %cst = arith.constant dense<0.000000e+00> : vector<8xf32>
    %4 = vector.multi_reduction <add>, %3, %cst [1] : vector<8x64xf32> to vector<8xf32>
    %5 = vector.shape_cast %4 : vector<8xf32> to vector<8x1xf32>
    %c0_3 = arith.constant 0 : index
    %c0_4 = arith.constant 0 : index
    %6 = memref.load %arg3[%c0_3, %c0_4] : memref<1x1xf32, #tpu.memory_space<smem>>
    %7 = vector.broadcast %6 : f32 to vector<8x1xf32>
    %8 = arith.addf %5, %7 : vector<8x1xf32>
    %c0_5 = arith.constant 0 : index
    %c0_6 = arith.constant 0 : index
    %9 = vector.load %arg4[%c0_5, %c0_6] : memref<8x1xf32, #tpu.memory_space<vmem>>, vector<8x1xf32>
    tpu.vector_store %arg4[%c0_5, %c0_6], %8 {strides = array<i32>} : memref<8x1xf32, #tpu.memory_space<vmem>>, vector<8x1xf32>,
    return
  }
  func.func @transform_0(%arg0: i32) -> (i32, i32) {
    %c0_i32 = arith.constant 0 : i32
    %c0_i32_0 = arith.constant 0 : i32
    return %arg0, %c0_i32 : i32, i32
  }
  func.func @transform_1(%arg0: i32) -> (i32, i32) {
    %c0_i32 = arith.constant 0 : i32
    %c0_i32_0 = arith.constant 0 : i32
    %c0_i32_1 = arith.constant 0 : i32
    return %c0_i32, %c0_i32_0 : i32, i32
  }
  func.func @transform_2(%arg0: i32) -> (i32, i32) {
    %c0_i32 = arith.constant 0 : i32
    %c0_i32_0 = arith.constant 0 : i32
    %c0_i32_1 = arith.constant 0 : i32
    return %c0_i32, %c0_i32_0 : i32, i32
  }
  func.func @transform_3(%arg0: i32) -> (i32, i32) {
    %c0_i32 = arith.constant 0 : i32
    %c0_i32_0 = arith.constant 0 : i32
    return %arg0, %c0_i32 : i32, i32
  }
}

</mosaic_0001>

<bundles_post_ra>
// kernel: tpu_custom_call.1
= control target key start
LH: loop header
LB: loop body
LE: loop exit
PB: predicated region body
PF: predicated region fallthrough
CT: control target
= control target key end

     0   :  { %9 = vsyncpa [#allocation4], 0  ;;  %s76_s12 = smov [#allocation3]   ;;  %s118_s0 = inlined_call_operand.hbm [shape: f32[8,64], index: 0, kind: input, shape index: {}]   ;;  %s119_s1 = inlined_call_operand.vmem [shape: f32[1,64], index: 1, kind: input, shape index: {}]   ;;  %s120_s2 = inlined_call_operand.<no memory space> [shape: f32[1,1], index: 2, kind: input, shape index: {}]   ;;  %s121_s3 = inlined_call_operand.vmem [shape: f32[8,1], index: 3, kind: output, shape index: {}]  }
   0x1   :  { %s16_s13 = sshll.u32 %s76_s12, 4  ;;  %s52_s16 = scalar_lea.hbm %s118_s0, 128  ;;  %s17_s13 = int_to_ptr.vmem [resolvable:$true] %s16_s13 }
   0x2   :  { %p53_p0 = scmp.ne.s32.totalorder %s118_s0, %s52_s16  ;;  %p56_p1 = scmp.lt.u32.totalorder %s52_s16, %s118_s0 }
   0x4   :  { %p58_p2 = pnand %p56_p1, %p53_p0 }
   0x6   :  { %61 = shalt.err (!%p58_p2)
}
   0x7   :  { %s62_s21 = scalar_lea.vmem %s17_s13, 128  ;;  %p67_p4 = scmp.lt.s32.totalorder %s17_s13, %s17_s13 }
   0x8   :  { %p63_p3 = scmp.ne.s32.totalorder %s17_s13, %s62_s21  ;;  %p68_p5 = scmp.lt.s32.totalorder %s62_s21, %s62_s21 }
   0xa   :  { %p69_p6 = por %p68_p5, %p67_p4 }
   0xc   :  { %p70_p7 = pnand %p69_p6, %p63_p3 }
   0xe   :  { %73 = shalt.err (!%p70_p7)
}
   0xf   :  { %19 = dma.hbm_to_vmem [thread:$0]  %s118_s0, 128, %s17_s13, [#allocation4]  }
  0x10   :  { %74 = dma.done.wait [#allocation4], 128  }
  0x11   :  { %75 = vsyncadd [#allocation4], 4294967168  ;;  %v27_v0 = vld [vmem:[#allocation3] sm:$0xff]  ;;  %vm36_vm0 = vcmask 523264   ;;  %v41_v4 = vstv %s120_s2  ;;  %vm43_vm1 = vcmask 7168  }
  0x12   :  { %v50_v1 = vld [vmem:[%s119_s1] ss:$0 sm:$0xff] }
  0x13   :  { %v35_v2 = vmul.f32 %v50_v1, %v27_v0 }
  0x15   :  { %v37_v3 = vsel %vm36_vm0, %v35_v2, 0.0 }
  0x16   :  { %38 = vadd.xlane.f32.xlu0 %v37_v3 }
  0xa3   :  { %v39_v5 = vpop.xlane.xlu0 %38 }
  0xa4   :  { %v42_v6 = vadd.f32 %v41_v4, %v39_v5 }
  0xa6   :  { %44 = vst.msk [vmem:[%s121_s3] sm:$0xff] %vm43_vm1, %v42_v6 }
  0xa7   :  { %49 = vsyncpa [#allocation4], 1 }

</bundles_post_ra>
